<compile_context>
chip_gen: v5e
topology: v5e:2x2
jax: 0.10.0
libtpu: 0.0.40
codegen_flags: <defaults>
</compile_context>

<pallas_src>
import jax
import jax.numpy as jnp
from jax.experimental import pallas as pl
from jax.experimental.pallas import tpu as pltpu


def masked_mlp_kernel(x_ref, w1_ref, b1_ref, w2_ref, b2_ref, out_ref):
    x = x_ref[...]                                                  # [TB, Dp] bf16

    # Linear 1 (MXU, fp32 accumulation) + bias + ReLU in fp32 (VPU).
    h = jnp.dot(x, w1_ref[...], preferred_element_type=jnp.float32)  # [TB, Hp] f32
    h = jnp.maximum(h + b1_ref[...], 0.0)

    # Linear 2 (MXU, fp32 accumulation) + bias.
    y = jnp.dot(h.astype(jnp.bfloat16), w2_ref[...],
                preferred_element_type=jnp.float32) + b2_ref[...]    # [TB, Cp] f32
    out_ref[...] = y.astype(out_ref.dtype)


def _round_up(n, m):
    return ((n + m - 1) // m) * m


def masked_network_forward(x, w1, m1, b1, w2, m2, b2, *, tb=256,
                           out_dtype=jnp.bfloat16):
    """MaskedNetwork forward: y = relu(x @ (w1*m1) + b1) @ (w2*m2) + b2."""
    B, D = x.shape
    H = w1.shape[1]
    C = w2.shape[1]
    b1 = b1.reshape(1, -1)
    b2 = b2.reshape(1, -1)

    # Lane-dense feature dims (multiples of 128); batch only to the sublane
    # multiple of 8 -- ragged last batch tile is handled by the cdiv grid.
    Dp, Hp, Cp = (_round_up(d, 128) for d in (D, H, C))
    Bp = _round_up(B, 8)

    # apply_mask folded into the weights (exact for a 0/1 mask), then bf16.
    w1m = (w1.astype(jnp.float32) * m1.astype(jnp.float32)).astype(jnp.bfloat16)
    w2m = (w2.astype(jnp.float32) * m2.astype(jnp.float32)).astype(jnp.bfloat16)

    def pad2(a, rows, cols):
        return jnp.pad(a, ((0, rows - a.shape[0]), (0, cols - a.shape[1])))

    xb = pad2(x.astype(jnp.bfloat16), Bp, Dp)
    w1p = pad2(w1m, Dp, Hp)
    w2p = pad2(w2m, Hp, Cp)
    b1p = pad2(b1.astype(jnp.float32), 1, Hp)
    b2p = pad2(b2.astype(jnp.float32), 1, Cp)

    # Batch tile: as large as requested, multiple of 8, but keep >= 2 grid
    # steps when the batch allows so both v7x TensorCores get work.
    tb = max(8, _round_up(tb, 8))
    tb_eff = min(tb, Bp)
    if Bp >= 256 and Bp <= tb_eff:
        tb_eff = _round_up(pl.cdiv(Bp, 2), 128)
    grid = (pl.cdiv(Bp, tb_eff),)

    resident = lambda r, c: pl.BlockSpec((r, c), lambda i: (0, 0))
    out_isize = jnp.dtype(out_dtype).itemsize

    # VMEM budget: resident weights/biases + double-buffered x/out tiles.
    resident_bytes = (Dp * Hp + Hp * Cp) * 2 + (Hp + Cp) * 4
    stream_bytes = 2 * (tb_eff * Dp * 2 + tb_eff * Cp * out_isize)
    vmem_limit = min(max(2 * (resident_bytes + stream_bytes) + (1 << 20),
                         16 * 1024 * 1024),
                     32 * 1024 * 1024)

    out_padded = pl.pallas_call(
        masked_mlp_kernel,
        out_shape=jax.ShapeDtypeStruct((Bp, Cp), out_dtype),
        grid=grid,
        in_specs=[
            pl.BlockSpec((tb_eff, Dp), lambda i: (i, 0)),  # x: tiled over batch
            resident(Dp, Hp),                              # w1*m1 (resident)
            resident(1, Hp),                               # b1
            resident(Hp, Cp),                              # w2*m2 (resident)
            resident(1, Cp),                               # b2
        ],
        out_specs=pl.BlockSpec((tb_eff, Cp), lambda i: (i, 0)),
        compiler_params=pltpu.CompilerParams(
            # TODO(synk): on v7x verify the batch split across both TCs; if
            # "parallel" is a no-op there, switch to an explicit core split.
            dimension_semantics=("parallel",),
            vmem_limit_bytes=vmem_limit,
        ),
        cost_estimate=pl.CostEstimate(
            flops=2 * Bp * (Dp * Hp + Hp * Cp),
            transcendentals=0,
            bytes_accessed=(xb.size + w1p.size + w2p.size) * 2
                           + (b1p.size + b2p.size) * 4
                           + Bp * Cp * out_isize,
        ),
    )(xb, w1p, b1p, w2p, b2p)

    return out_padded[:B, :C]


def reference_forward(x, w1, m1, b1, w2, m2, b2):
    # Pure-JAX reference with the same numerics as the kernel:
    # bf16-quantized inputs/masked weights, fp32 accumulation, bf16 hidden.
    bf = lambda a: a.astype(jnp.bfloat16).astype(jnp.float32)
    w1m = bf(w1.astype(jnp.float32) * m1.astype(jnp.float32))
    w2m = bf(w2.astype(jnp.float32) * m2.astype(jnp.float32))
    h = jnp.maximum(bf(x) @ w1m + b1.reshape(1, -1), 0.0)
    h = bf(h)  # kernel feeds bf16 hidden activations to the second matmul
    return h @ w2m + b2.reshape(1, -1)


# TODO(synk): weight save/load, loss(), and train()/eval() mode switching of
# MaskedNetwork are host-side framework plumbing with no forward-compute
# equivalent; only forward() (apply_mask + inner MLP) is implemented here.

if __name__ == "__main__":
    # Logical shapes: D/C deliberately not lane-dense so the feature-padding
    # path is exercised; batch 256 gives a 2-step grid (one per TC on v7x).
    B, D, H, C = 256, 64, 128, 32

    key = jax.random.PRNGKey(0)
    kx, kw1, kb1, kw2, kb2, km1, km2 = jax.random.split(key, 7)

    x = jax.random.normal(kx, (B, D), dtype=jnp.float32)

    # Deterministic synthetic parameters (no checkpoint).
    w1 = jax.random.normal(kw1, (D, H), dtype=jnp.float32) * 0.1
    b1 = jax.random.normal(kb1, (1, H), dtype=jnp.float32) * 0.1
    w2 = jax.random.normal(kw2, (H, C), dtype=jnp.float32) * 0.1
    b2 = jax.random.normal(kb2, (1, C), dtype=jnp.float32) * 0.1

    # Binary pruning masks (the `mask` dict of MaskedNetwork).
    m1 = jax.random.bernoulli(km1, 0.5, (D, H)).astype(jnp.float32)
    m2 = jax.random.bernoulli(km2, 0.5, (H, C)).astype(jnp.float32)

    out = jax.block_until_ready(masked_network_forward(x, w1, m1, b1, w2, m2, b2))
    ref = reference_forward(x, w1, m1, b1, w2, m2, b2)

    assert out.shape == (B, C)
    err = jnp.max(jnp.abs(out.astype(jnp.float32) - ref))
    # Output is bf16 (<=~0.4% relative rounding) on top of matching-precision
    # accumulation; 2e-2 combined tolerance is comfortably above that.
    assert jnp.allclose(out.astype(jnp.float32), ref, atol=2e-2, rtol=2e-2), float(err)

    print("KERNEL_OK")
</pallas_src>

<mosaic_0001>
module attributes {stable_mosaic.version = 11 : i64} {
  func.func @masked_mlp_kernel(%arg0: i32, %arg1: memref<128x128xbf16, #tpu.memory_space<vmem>>, %arg2: memref<128x128xbf16, #tpu.memory_space<vmem>>, %arg3: memref<1x128xf32, #tpu.memory_space<vmem>>, %arg4: memref<128x128xbf16, #tpu.memory_space<vmem>>, %arg5: memref<1x128xf32, #tpu.memory_space<vmem>>, %arg6: memref<128x128xbf16, #tpu.memory_space<vmem>>) attributes {dimension_semantics = [#tpu.dimension_semantics<parallel>], iteration_bounds = array<i64: 2>, scalar_prefetch = 0 : i64, scratch_operands = 0 : i64, tpu.core_type = #tpu.core_type<tc>, window_params = [{transform_indices = @transform_0, window_bounds = array<i64: 128, 128>}, {pipeline_mode = #tpu.pipeline_mode<synchronous>, transform_indices = @transform_1, window_bounds = array<i64: 128, 128>}, {pipeline_mode = #tpu.pipeline_mode<synchronous>, transform_indices = @transform_2, window_bounds = array<i64: 1, 128>}, {pipeline_mode = #tpu.pipeline_mode<synchronous>, transform_indices = @transform_3, window_bounds = array<i64: 128, 128>}, {pipeline_mode = #tpu.pipeline_mode<synchronous>, transform_indices = @transform_4, window_bounds = array<i64: 1, 128>}, {transform_indices = @transform_5, window_bounds = array<i64: 128, 128>}]} {
    %c0 = arith.constant 0 : index
    %c0_0 = arith.constant 0 : index
    %0 = vector.load %arg1[%c0, %c0_0] : memref<128x128xbf16, #tpu.memory_space<vmem>>, vector<128x128xbf16>
    %c0_1 = arith.constant 0 : index
    %c0_2 = arith.constant 0 : index
    %1 = vector.load %arg2[%c0_1, %c0_2] : memref<128x128xbf16, #tpu.memory_space<vmem>>, vector<128x128xbf16>
    %cst = arith.constant dense<0.000000e+00> : vector<128x128xf32>
    %2 = tpu.matmul %0, %1, %cst {dimension_numbers = #tpu.dot_dimension_numbers<[1], [0], [0], [1], [0, 0, 1, 1], [], []>} : vector<128x128xbf16>, vector<128x128xbf16>, vector<128x128xf32> -> vector<128x128xf32>
    %c0_3 = arith.constant 0 : index
    %c0_4 = arith.constant 0 : index
    %3 = vector.load %arg3[%c0_3, %c0_4] : memref<1x128xf32, #tpu.memory_space<vmem>>, vector<1x128xf32>
    %4 = vector.broadcast %3 : vector<1x128xf32> to vector<128x128xf32>
    %5 = arith.addf %2, %4 : vector<128x128xf32>
    %cst_5 = arith.constant 0.000000e+00 : f32
    %6 = vector.broadcast %cst_5 : f32 to vector<128x128xf32>
    %7 = arith.maximumf %5, %6 : vector<128x128xf32>
    %8 = arith.truncf %7 : vector<128x128xf32> to vector<128x128xbf16>
    %c0_6 = arith.constant 0 : index
    %c0_7 = arith.constant 0 : index
    %9 = vector.load %arg4[%c0_6, %c0_7] : memref<128x128xbf16, #tpu.memory_space<vmem>>, vector<128x128xbf16>
    %cst_8 = arith.constant dense<0.000000e+00> : vector<128x128xf32>
    %10 = tpu.matmul %8, %9, %cst_8 {dimension_numbers = #tpu.dot_dimension_numbers<[1], [0], [0], [1], [0, 0, 1, 1], [], []>} : vector<128x128xbf16>, vector<128x128xbf16>, vector<128x128xf32> -> vector<128x128xf32>
    %c0_9 = arith.constant 0 : index
    %c0_10 = arith.constant 0 : index
    %11 = vector.load %arg5[%c0_9, %c0_10] : memref<1x128xf32, #tpu.memory_space<vmem>>, vector<1x128xf32>
    %12 = vector.broadcast %11 : vector<1x128xf32> to vector<128x128xf32>
    %13 = arith.addf %10, %12 : vector<128x128xf32>
    %14 = arith.truncf %13 : vector<128x128xf32> to vector<128x128xbf16>
    %c0_11 = arith.constant 0 : index
    %c0_12 = arith.constant 0 : index
    %15 = vector.load %arg6[%c0_11, %c0_12] : memref<128x128xbf16, #tpu.memory_space<vmem>>, vector<128x128xbf16>
    tpu.vector_store %arg6[%c0_11, %c0_12], %14 {strides = array<i32>} : memref<128x128xbf16, #tpu.memory_space<vmem>>, vector<128x128xbf16>,
    return
  }
  func.func @transform_0(%arg0: i32) -> (i32, i32) {
    %c0_i32 = arith.constant 0 : i32
    %c0_i32_0 = arith.constant 0 : i32
    return %arg0, %c0_i32 : i32, i32
  }
  func.func @transform_1(%arg0: i32) -> (i32, i32) {
    %c0_i32 = arith.constant 0 : i32
    %c0_i32_0 = arith.constant 0 : i32
    %c0_i32_1 = arith.constant 0 : i32
    return %c0_i32, %c0_i32_0 : i32, i32
  }
  func.func @transform_2(%arg0: i32) -> (i32, i32) {
    %c0_i32 = arith.constant 0 : i32
    %c0_i32_0 = arith.constant 0 : i32
    %c0_i32_1 = arith.constant 0 : i32
    return %c0_i32, %c0_i32_0 : i32, i32
  }
  func.func @transform_3(%arg0: i32) -> (i32, i32) {
    %c0_i32 = arith.constant 0 : i32
    %c0_i32_0 = arith.constant 0 : i32
    %c0_i32_1 = arith.constant 0 : i32
    return %c0_i32, %c0_i32_0 : i32, i32
  }
  func.func @transform_4(%arg0: i32) -> (i32, i32) {
    %c0_i32 = arith.constant 0 : i32
    %c0_i32_0 = arith.constant 0 : i32
    %c0_i32_1 = arith.constant 0 : i32
    return %c0_i32, %c0_i32_0 : i32, i32
  }
  func.func @transform_5(%arg0: i32) -> (i32, i32) {
    %c0_i32 = arith.constant 0 : i32
    %c0_i32_0 = arith.constant 0 : i32
    return %arg0, %c0_i32 : i32, i32
  }
}

</mosaic_0001>

<bundles_post_ra>
// kernel: tpu_custom_call.1
= control target key start
LH: loop header
LB: loop body
LE: loop exit
PB: predicated region body
PF: predicated region fallthrough
CT: control target
= control target key end

     0   :  { %10 = vsyncpa [#allocation3], 0  ;;  %s1397_s0 = inlined_call_operand.hbm [shape: bf16[256,128], index: 0, kind: input, shape index: {}]   ;;  %s1398_s1 = inlined_call_operand.hbm [shape: bf16[128,128], index: 1, kind: input, shape index: {}]   ;;  %s1399_s2 = inlined_call_operand.vmem [shape: f32[1,128], index: 2, kind: input, shape index: {}]   ;;  %s1400_s3 = inlined_call_operand.hbm [shape: bf16[128,128], index: 3, kind: input, shape index: {}]   ;;  %s1401_s4 = inlined_call_operand.vmem [shape: f32[1,128], index: 4, kind: input, shape index: {}]   ;;  %s1402_s5 = inlined_call_operand.hbm [shape: bf16[256,128], index: 5, kind: output, shape index: {}]  }
   0x1   :  { %12 = vsyncpa [#allocation3 + $0x1], 0 }
   0x2   :  { %13 = vsyncpa [#allocation6], 0 }
   0x3   :  { %14 = vsyncpa [#allocation4], 0 }
   0x4   :  { %16 = vsyncpa [#allocation4 + $0x1], 0  ;;  %s1216_s18 = smov 0   ;;  %s1218_s19 = smov 0  }
   0x5   :  { %s1220_s20 = smov 0   ;;  %s1222_s21 = smov 0  }
   0x6 LB: > { %s1237_s22 = sadd.s32 4294967295, %s1178_s21   ;;  %s742_s23 = sadd.s32 4294967294, %s1178_s21   ;;  %s1178_s21 = sphi %s1222_s21, %s1414_s21   ;;  %s1174_s20 = sphi %s1220_s20, %s1413_s20   ;;  %s1170_s19 = sphi %s1218_s19, %s1412_s19   ;;  %s1166_s18 = sphi %s1216_s18, %s1411_s18  }
   0x7   : > { %p42_p0 = scmp.ne.s32.totalorder %s1170_s19, %s1166_s18  ;;  %p43_p1 = scmp.eq.s32.totalorder %s1237_s22, 0 }
   0x8   : > { %p150_p2 = scmp.eq.s32.totalorder %s1237_s22, 1  ;;  %p156_p3 = scmp.eq.s32.totalorder %s742_s23, 1 }
   0x9   : > { %p1246_p4 = por %p43_p1, %p42_p0  ;;  %p743_p5 = scmp.ge.s32.totalorder %s1178_s21, 1 }
   0xa   : > { %p1251_p6 = por %p156_p3, %p42_p0  ;;  %p163_p7 = scmp.lt.s32.totalorder %s1178_s21, 3 }
   0xb   : > { %s174_s28 = sshll.u32 %s1398_s1, 4  ;;  %s1180_s30 = smov [#allocation5]   ;;  %s175_s28 = int_to_ptr.hbm [resolvable:$true] %s174_s28 }
   0xc   : > { %p1259_p8 = pnand %p743_p5, %p163_p7  ;;  %s176_s6 = sshll.u32 %s1180_s30, 4  ;;  %s177_s6 = int_to_ptr.vmem [resolvable:$true] %s176_s6 }
   0xd   : > { %s191_s9 = sshll.u32 %s1400_s3, 4  ;;  %s1403_s10 = smov 64   ;;  %s192_s9 = int_to_ptr.hbm [resolvable:$true] %s191_s9 }
   0xe   : > { %p957_p9 = pneg %p1259_p8  ;;  %s1182_s11 = smov 4  }
   0xf   : > { %s1183_s12 = smov [#allocation7]   ;;  %s1278_s14 = sadd.s32 1, %s1178_s21  }
  0x10   : > { %p958_p10 = pnand %p957_p9, %p43_p1  ;;  %s193_s13 = sshll.u32 %s1183_s12, 4  ;;  %s194_s13 = int_to_ptr.vmem [resolvable:$true] %s193_s13 }
  0x11   : > { %s29_s15 = sadd.s32 1, %s1174_s20  ;;  %s26_s16 = ssub.s32 %s1178_s21, %s1278_s14 }
  0x12   : > { %960 = dma.hbm_to_vmem [thread:$0]  (!%p958_p10), %s175_s28, 1024, %s177_s6, [#allocation6], %s1403_s10, %s1403_s10, %s1182_s11  }
  0x13   : > { %963 = dma.hbm_to_vmem [thread:$0]  (!%p958_p10), %s192_s9, 1024, %s194_s13, [#allocation6], %s1403_s10, %s1403_s10, %s1182_s11  }
  0x14   : > { %p36_p12 = scmp.ne.s32.totalorder %s1174_s20, %s1170_s19  ;;  %p27_p13 = scmp.eq.s32.totalorder %s26_s16, 0 }
  0x15   : > { %p37_p0 = scmp.eq.s32.totalorder %s1178_s21, 0  ;;  %p974_p5 = scmp.lt.s32.totalorder %s1178_s21, 2 }
  0x16   : > { %p1288_p3 = por %p150_p2, %p36_p12  ;;  %s210_s26 = sand.u32 1, %s1174_s20  }
  0x17   : > { %s1294_s23 = scalar_select %p27_p13, %s1174_s20, %s29_s15  }
  0x18   : > { %p38_p7 = por %p37_p0, %p36_p12  ;;  %s747_s27 = sshll.u32 %s210_s26, 6 }
  0x19   : > { %s856_s28 = sshll.u32 %s1178_s21, 6  ;;  %s214_s8 = scalar_lea.vmem [#allocation2], %s747_s27 }
  0x1a   : > { %s219_s7 = scalar_lea.hbm %s1397_s0, %s856_s28  ;;  %s222_s9 = sshll.u32 %s214_s8, 4  ;;  %s223_s9 = int_to_ptr.vmem [resolvable:$true] %s222_s9 }
  0x1b   : > { %s220_s12 = sshll.u32 %s219_s7, 4  ;;  %p1301_p2 = pnand %p974_p5, %p38_p7  ;;  %s221_s12 = int_to_ptr.hbm [resolvable:$true] %s220_s12 }
  0x1c   : > { %s211_s15 = scalar_lea.sflag [#allocation3], %s210_s26  ;;  %s1078_s16 = sshra.s32 %s221_s12, 4  ;;  %s1079_s16 = int_to_ptr.hbm [resolvable:$true] %s1078_s16 }
  0x1d   : > { %s1080_s10 = scalar_lea.hbm %s1079_s16, 64  ;;  %p1082_p10 = pneg %p1301_p2 }
  0x1e   : > { %p1081_p9 = scmp.ne.s32.totalorder %s1079_s16, %s1080_s10  ;;  %s1085_s30 = scalar_lea.hbm %s1397_s0, 128 }
  0x1f   : > { %p1086_p0 = scmp.lt.s32.totalorder %s1079_s16, %s1397_s0  ;;  %p1087_p5 = scmp.lt.s32.totalorder %s1085_s30, %s1080_s10 }
  0x20   : > { %p1083_p12 = pnand %p1082_p10, %p1081_p9 }
  0x21   : > { %p1088_p7 = por %p1087_p5, %p1086_p0 }
  0x22   : > { %p1084_p13 = pneg %p1083_p12 }
  0x24   : > { %p1089_p11 = pnand %p1088_p7, %p1084_p13 }
  0x26   : > { %1092 = shalt.err (!%p1089_p11)
}
  0x27   : > { %s1409_s26 = smov 64   ;;  %234 = sbr.rel (%p1259_p8) target bundleno = 421 (0x1a5), region = 40 }
  0x28   : > { %967 = dma.hbm_to_vmem [thread:$0]  (!%p1301_p2), %s221_s12, 1024, %s223_s9, %s211_s15, %s1409_s26, %s1409_s26, %s1182_s11  }
  0x29   : > { %s1321_s8 = sand.u32 (!%p1259_p8), 1, %s1170_s19  }
  0x2a   : > { %s751_s10 = sshll.u32 (!%p1259_p8), %s1321_s8, 6  ;;  %s237_s16 = scalar_lea.sflag (!%p1259_p8), [#allocation3], %s1321_s8 }
  0x2b   : > { %s1327_s28 = scalar_lea.vmem (!%p1259_p8), [#allocation2], %s751_s10 }
  0x2c   : > { %1153 = dma.done.wait (%p1246_p4), %s237_s16, 1024  }
  0x2d   : > { %1155 = vsyncadd (%p1246_p4), %s237_s16, 4294966272 }
  0x2e   : > { %1157 = dma.done.wait (%p43_p1), [#allocation6], 2048  }
  0x2f   : > { %1159 = vsyncadd (%p43_p1), [#allocation6], 4294965248  ;;  %v872_v0 = vld [vmem:[#allocation5 + $0x38] sm:$0xff]  ;;  %v871_v1 = vld [vmem:[#allocation5 + $0x30] sm:$0xff]  ;;  %s1353_s12 = scalar_lea.vmem [#allocation8], %s751_s10  ;;  %s881_s13 = sshll.u32 %s1237_s22, 6 }
  0x30   : > { %412 = vmatpush.bf16.msra.mxu0 %v872_v0  ;;  %929 = vmatpush.bf16.msra.mxu2 %v872_v0  ;;  %v870_v2 = vld [vmem:[#allocation5 + $0x28] sm:$0xff]  ;;  %v869_v3 = vld [vmem:[#allocation5 + $0x20] sm:$0xff]  ;;  %v868_v4 = vld [vmem:[#allocation5 + $0x18] sm:$0xff]  ;;  %s646_s30 = scalar_lea.hbm %s1402_s5, %s881_s13  ;;  %s647_s6 = sshll.u32 %s1353_s12, 4  ;;  %s648_s6 = int_to_ptr.vmem [resolvable:$true] %s647_s6 }
  0x31   : > { %v867_v5 = vld [vmem:[#allocation5 + $0x10] sm:$0xff]  ;;  %v866_v6 = vld [vmem:[#allocation5 + $0x8] sm:$0xff]  ;;  %v865_v7 = vld [vmem:[#allocation5] sm:$0xff]  ;;  %s649_s7 = sshll.u32 %s646_s30, 4  ;;  %s635_s26 = scalar_lea.sflag [#allocation4], %s1321_s8  ;;  %s650_s7 = int_to_ptr.hbm [resolvable:$true] %s649_s7 }
  0x32   : > { %v857_v8 = vld [vmem:[%s1327_s28] sm:$0xff]  ;;  %v858_v10 = vld [vmem:[%s1327_s28 + $0x8] sm:$0xff]  ;;  %v880_v12 = vld [vmem:[#allocation7 + $0x38] sm:$0xff]  ;;  %s1122_s10 = sshra.s32 %s650_s7, 4  ;;  %s1128_s24 = scalar_lea.hbm %s1402_s5, 128  ;;  %s1123_s10 = int_to_ptr.hbm [resolvable:$true] %s1122_s10 }
  0x33   : > { %v861_v9 = vld [vmem:[%s1327_s28 + $0x20] sm:$0xff]  ;;  %v862_v11 = vld [vmem:[%s1327_s28 + $0x28] sm:$0xff]  ;;  %553 = vmatpush.bf16.msra.mxu1 %v880_v12  ;;  %v879_v13 = vld [vmem:[#allocation7 + $0x30] sm:$0xff]  ;;  %937 = vmatpush.bf16.msra.mxu3 %v880_v12  ;;  %s1124_s16 = scalar_lea.hbm %s1123_s10, 64  ;;  %p1129_p11 = scmp.lt.s32.totalorder %s1123_s10, %s1402_s5 }
  0x34   : > { %413 = vmatpush.bf16.msra.mxu0 %v871_v1  ;;  %930 = vmatpush.bf16.msra.mxu2 %v871_v1  ;;  %v878_v14 = vld [vmem:[#allocation7 + $0x28] sm:$0xff]  ;;  %v877_v15 = vld [vmem:[#allocation7 + $0x20] sm:$0xff]  ;;  %v859_v16 = vld [vmem:[%s1327_s28 + $0x10] sm:$0xff]  ;;  %p1125_p1 = scmp.ne.s32.totalorder %s1123_s10, %s1124_s16  ;;  %p1130_p2 = scmp.lt.s32.totalorder %s1128_s24, %s1124_s16 }
  0x35   : > { %v863_v17 = vld [vmem:[%s1327_s28 + $0x30] sm:$0xff]  ;;  %v860_v18 = vld [vmem:[%s1327_s28 + $0x18] sm:$0xff]  ;;  %v874_v22 = vld [vmem:[#allocation7 + $0x8] sm:$0xff] }
  0x36   : > { %v864_v19 = vld [vmem:[%s1327_s28 + $0x38] sm:$0xff]  ;;  %v875_v21 = vld [vmem:[#allocation7 + $0x10] sm:$0xff]  ;;  %v873_v23 = vld [vmem:[#allocation7] sm:$0xff]  ;;  %p1126_p4 = pnand %p1125_p1, %p1288_p3  ;;  %p1131_p9 = por %p1130_p2, %p1129_p11 }
  0x37   : > { %554 = vmatpush.bf16.msra.mxu1 %v879_v13  ;;  %938 = vmatpush.bf16.msra.mxu3 %v879_v13  ;;  %v876_v20 = vld [vmem:[#allocation7 + $0x18] sm:$0xff]  ;;  %v1016_v25 = vld [vmem:[%s1399_s2] ss:$0 sm:$0xff] }
  0x38   : > { %414 = vmatpush.bf16.msra.mxu0 %v870_v2  ;;  %931 = vmatpush.bf16.msra.mxu2 %v870_v2  ;;  %p1127_p8 = pneg %p1126_p4 }
  0x3a   : > { %p1132_p10 = pnand %p1131_p9, %p1127_p8 }
  0x3b   : > { %555 = vmatpush.bf16.msra.mxu1 %v878_v14  ;;  %939 = vmatpush.bf16.msra.mxu3 %v878_v14 }
  0x3c   : > { %415 = vmatpush.bf16.msra.mxu0 %v869_v3  ;;  %932 = vmatpush.bf16.msra.mxu2 %v869_v3 }
  0x3f   : > { %556 = vmatpush.bf16.msra.mxu1 %v877_v15  ;;  %940 = vmatpush.bf16.msra.mxu3 %v877_v15 }
  0x40   : > { %416 = vmatpush.bf16.msra.mxu0 %v868_v4  ;;  %933 = vmatpush.bf16.msra.mxu2 %v868_v4 }
  0x43   : > { %557 = vmatpush.bf16.msra.mxu1 %v876_v20  ;;  %941 = vmatpush.bf16.msra.mxu3 %v876_v20 }
  0x44   : > { %417 = vmatpush.bf16.msra.mxu0 %v867_v5  ;;  %934 = vmatpush.bf16.msra.mxu2 %v867_v5 }
  0x47   : > { %558 = vmatpush.bf16.msra.mxu1 %v875_v21  ;;  %942 = vmatpush.bf16.msra.mxu3 %v875_v21 }
  0x48   : > { %418 = vmatpush.bf16.msra.mxu0 %v866_v6  ;;  %935 = vmatpush.bf16.msra.mxu2 %v866_v6 }
  0x4b   : > { %559 = vmatpush.bf16.msra.mxu1 %v874_v22  ;;  %943 = vmatpush.bf16.msra.mxu3 %v874_v22 }
  0x4c   : > { %419 = vmatpush.bf16.msra.mxu0 %v865_v7  ;;  %936 = vmatpush.bf16.msra.mxu2 %v865_v7 }
  0x4f   : > { %420 = vmatmul.bf16.vlgmr.msra.gmra.mxu0 %v857_v8  ;;  %440 = vmatmul.bf16.vlgmr.msra.gmra.mxu2 %v861_v9 }
  0x50   : > { %560 = vmatpush.bf16.msra.mxu1 %v873_v23  ;;  %944 = vmatpush.bf16.msra.mxu3 %v873_v23 }
  0x5f   : > { %425 = vmatmul.bf16.gmra.mxu0 %v858_v10  ;;  %445 = vmatmul.bf16.gmra.mxu2 %v862_v11 }
  0x6f   : > { %430 = vmatmul.bf16.gmra.mxu0 %v859_v16  ;;  %450 = vmatmul.bf16.gmra.mxu2 %v863_v17 }
  0x7f   : > { %435 = vmatmul.bf16.gmra.mxu0 %v860_v18  ;;  %455 = vmatmul.bf16.gmra.mxu2 %v864_v19  ;;  %v1017_v18 = vld [vmem:[%s1401_s4] ss:$0 sm:$0xff] }
  0xcc   : > { %v421_v24 = vpop.f32.mrf.mxu0 }
  0xcd   : > { %v422_v26 = vadd.f32 %v1016_v25, %v421_v24 }
  0xcf   : > { %v461_v29 = vmax.f32 %v422_v26, 0.0 }
  0xd2   : > { %v441_v27 = vpop.f32.mrf.mxu2 }
  0xd3   : > { %v442_v32 = vadd.f32 %v1016_v25, %v441_v27 }
  0xd4   : > { %v423_v28 = vpop.f32.mrf.mxu0 }
  0xd5   : > { %v424_v30 = vadd.f32 %v1016_v25, %v423_v28  ;;  %v469_v37 = vmax.f32 %v442_v32, 0.0 }
  0xd7   : > { %v462_v31 = vmax.f32 %v424_v30, 0.0 }
  0xd9   : > { %v477_v33 = vpack.c.bf16 %v462_v31, %v461_v29 }
  0xda   : > { %v443_v34 = vpop.f32.mrf.mxu2 }
  0xdb   : > { %v444_v35 = vadd.f32 %v1016_v25, %v443_v34  ;;  %561 = vmatmul.bf16.vlgmr.msra.gmra.mxu1 %v477_v33 }
  0xdc   : > { %v426_v36 = vpop.f32.mrf.mxu0 }
  0xdd   : > { %v470_v38 = vmax.f32 %v444_v35, 0.0  ;;  %v427_v40 = vadd.f32 %v1016_v25, %v426_v36 }
  0xdf   : > { %v481_v39 = vpack.c.bf16 %v470_v38, %v469_v37  ;;  %v463_v43 = vmax.f32 %v427_v40, 0.0 }
  0xe1   : > { %581 = vmatmul.bf16.vlgmr.msra.gmra.mxu3 %v481_v39 }
  0xe2   : > { %v446_v41 = vpop.f32.mrf.mxu2 }
  0xe3   : > { %v447_v46 = vadd.f32 %v1016_v25, %v446_v41 }
  0xe4   : > { %v428_v42 = vpop.f32.mrf.mxu0 }
  0xe5   : > { %v429_v44 = vadd.f32 %v1016_v25, %v428_v42  ;;  %v471_v51 = vmax.f32 %v447_v46, 0.0 }
  0xe7   : > { %v464_v45 = vmax.f32 %v429_v44, 0.0 }
  0xe9   : > { %v478_v47 = vpack.c.bf16 %v464_v45, %v463_v43 }
  0xea   : > { %v448_v48 = vpop.f32.mrf.mxu2 }
  0xeb   : > { %v449_v49 = vadd.f32 %v1016_v25, %v448_v48  ;;  %566 = vmatmul.bf16.gmra.mxu1 %v478_v47 }
  0xec   : > { %v431_v50 = vpop.f32.mrf.mxu0 }
  0xed   : > { %v472_v52 = vmax.f32 %v449_v49, 0.0  ;;  %v432_v54 = vadd.f32 %v1016_v25, %v431_v50 }
  0xef   : > { %v482_v53 = vpack.c.bf16 %v472_v52, %v471_v51  ;;  %v465_v57 = vmax.f32 %v432_v54, 0.0 }
  0xf1   : > { %586 = vmatmul.bf16.gmra.mxu3 %v482_v53 }
  0xf2   : > { %v451_v55 = vpop.f32.mrf.mxu2 }
  0xf3   : > { %v452_v60 = vadd.f32 %v1016_v25, %v451_v55 }
  0xf4   : > { %v433_v56 = vpop.f32.mrf.mxu0 }
  0xf5   : > { %v434_v58 = vadd.f32 %v1016_v25, %v433_v56  ;;  %v473_v1 = vmax.f32 %v452_v60, 0.0 }
  0xf7   : > { %v466_v59 = vmax.f32 %v434_v58, 0.0 }
  0xf9   : > { %v479_v61 = vpack.c.bf16 %v466_v59, %v465_v57 }
  0xfa   : > { %v453_v62 = vpop.f32.mrf.mxu2 }
  0xfb   : > { %v454_v63 = vadd.f32 %v1016_v25, %v453_v62  ;;  %571 = vmatmul.bf16.gmra.mxu1 %v479_v61 }
  0xfc   : > { %v436_v0 = vpop.f32.mrf.mxu0 }
  0xfd   : > { %v474_v2 = vmax.f32 %v454_v63, 0.0  ;;  %v437_v4 = vadd.f32 %v1016_v25, %v436_v0 }
  0xff   : > { %v483_v3 = vpack.c.bf16 %v474_v2, %v473_v1  ;;  %v467_v7 = vmax.f32 %v437_v4, 0.0 }
 0x101   : > { %591 = vmatmul.bf16.gmra.mxu3 %v483_v3 }
 0x102   : > { %v456_v5 = vpop.f32.mrf.mxu2 }
 0x103   : > { %v457_v10 = vadd.f32 %v1016_v25, %v456_v5 }
 0x104   : > { %v438_v6 = vpop.f32.mrf.mxu0 }
 0x105   : > { %v439_v8 = vadd.f32 %v1016_v25, %v438_v6  ;;  %v475_v14 = vmax.f32 %v457_v10, 0.0 }
 0x107   : > { %v468_v9 = vmax.f32 %v439_v8, 0.0 }
 0x109   : > { %v480_v11 = vpack.c.bf16 %v468_v9, %v467_v7 }
 0x10a   : > { %v458_v12 = vpop.f32.mrf.mxu2 }
 0x10b   : > { %v459_v13 = vadd.f32 %v1016_v25, %v458_v12  ;;  %576 = vmatmul.bf16.gmra.mxu1 %v480_v11 }
 0x10d   : > { %v476_v15 = vmax.f32 %v459_v13, 0.0 }
 0x10f   : > { %v484_v16 = vpack.c.bf16 %v476_v15, %v475_v14 }
 0x111   : > { %596 = vmatmul.bf16.gmra.mxu3 %v484_v16 }
 0x158   : > { %v562_v17 = vpop.f32.mrf.mxu1 }
 0x159   : > { %v563_v20 = vadd.f32 %v1017_v18, %v562_v17 }
 0x160   : > { %v564_v19 = vpop.f32.mrf.mxu1 }
 0x161   : > { %v565_v21 = vadd.f32 %v1017_v18, %v564_v19 }
 0x163   : > { %v885_v22 = vpack.c.bf16 %v565_v21, %v563_v20 }
 0x164   : > { %v582_v23 = vpop.f32.mrf.mxu3 }
 0x165   : > { %886 = vst [vmem:[%s1353_s12] sm:$0xff] %v885_v22   ;;  %v583_v26 = vadd.f32 %v1017_v18, %v582_v23 }
 0x168   : > { %v567_v24 = vpop.f32.mrf.mxu1 }
 0x169   : > { %v568_v30 = vadd.f32 %v1017_v18, %v567_v24 }
 0x16c   : > { %v584_v25 = vpop.f32.mrf.mxu3 }
 0x16d   : > { %v585_v27 = vadd.f32 %v1017_v18, %v584_v25 }
 0x16f   : > { %v905_v28 = vpack.c.bf16 %v585_v27, %v583_v26 }
 0x170   : > { %v569_v29 = vpop.f32.mrf.mxu1 }
 0x171   : > { %925 = vst [vmem:[%s1353_s12 + $0x20] sm:$0xff] %v905_v28   ;;  %v570_v31 = vadd.f32 %v1017_v18, %v569_v29 }
 0x173   : > { %v890_v32 = vpack.c.bf16 %v570_v31, %v568_v30 }
 0x174   : > { %v587_v33 = vpop.f32.mrf.mxu3 }
 0x175   : > { %922 = vst [vmem:[%s1353_s12 + $0x8] sm:$0xff] %v890_v32   ;;  %v588_v36 = vadd.f32 %v1017_v18, %v587_v33 }
 0x178   : > { %v572_v34 = vpop.f32.mrf.mxu1 }
 0x179   : > { %v573_v40 = vadd.f32 %v1017_v18, %v572_v34 }
 0x17c   : > { %v589_v35 = vpop.f32.mrf.mxu3 }
 0x17d   : > { %v590_v37 = vadd.f32 %v1017_v18, %v589_v35 }
 0x17f   : > { %v910_v38 = vpack.c.bf16 %v590_v37, %v588_v36 }
 0x180   : > { %v574_v39 = vpop.f32.mrf.mxu1 }
 0x181   : > { %926 = vst [vmem:[%s1353_s12 + $0x28] sm:$0xff] %v910_v38   ;;  %v575_v41 = vadd.f32 %v1017_v18, %v574_v39 }
 0x183   : > { %v895_v42 = vpack.c.bf16 %v575_v41, %v573_v40 }
 0x184   : > { %v592_v43 = vpop.f32.mrf.mxu3 }
 0x185   : > { %923 = vst [vmem:[%s1353_s12 + $0x10] sm:$0xff] %v895_v42   ;;  %v593_v46 = vadd.f32 %v1017_v18, %v592_v43 }
 0x188   : > { %v577_v44 = vpop.f32.mrf.mxu1 }
 0x189   : > { %v578_v50 = vadd.f32 %v1017_v18, %v577_v44 }
 0x18c   : > { %v594_v45 = vpop.f32.mrf.mxu3 }
 0x18d   : > { %v595_v47 = vadd.f32 %v1017_v18, %v594_v45 }
 0x18f   : > { %v915_v48 = vpack.c.bf16 %v595_v47, %v593_v46 }
 0x190   : > { %v579_v49 = vpop.f32.mrf.mxu1 }
 0x191   : > { %927 = vst [vmem:[%s1353_s12 + $0x30] sm:$0xff] %v915_v48   ;;  %v580_v51 = vadd.f32 %v1017_v18, %v579_v49 }
 0x193   : > { %v900_v52 = vpack.c.bf16 %v580_v51, %v578_v50 }
 0x194   : > { %v597_v53 = vpop.f32.mrf.mxu3 }
 0x195   : > { %924 = vst [vmem:[%s1353_s12 + $0x18] sm:$0xff] %v900_v52   ;;  %v598_v55 = vadd.f32 %v1017_v18, %v597_v53 }
 0x19c   : > { %v599_v54 = vpop.f32.mrf.mxu3 }
 0x19d   : > { %v600_v56 = vadd.f32 %v1017_v18, %v599_v54 }
 0x19f   : > { %v920_v57 = vpack.c.bf16 %v600_v56, %v598_v55 }
 0x1a1   : > { %928 = vst [vmem:[%s1353_s12 + $0x38] sm:$0xff] %v920_v57  }
 0x1a2   : > { %1135 = shalt.err (!%p1132_p10)
}
 0x1a3   : > { %s1184_s8 = smov 64   ;;  %s1185_s9 = smov 4  }
 0x1a4   : > { %955 = dma.vmem_to_hbm [thread:$0]  (%p1288_p3), %s648_s6, 1024, %s650_s7, %s635_s26, %s1184_s8, %s1184_s8, %s1185_s9  }
 0x1a5 PF: > { %s664_s12 = sand.u32 1, %s1166_s18   ;;  %p1410_p12 = scmp.ge.s32.totalorder %s1178_s21, 2 }
 0x1a6   : > { %s665_s13 = scalar_lea.sflag [#allocation4], %s664_s12 }
 0x1a7   : > { %p969_p13 = pnand %p1410_p12, %p1251_p6 }
 0x1a9   : > { %p970_p0 = pneg %p969_p13 }
 0x1ab   : > { %1161 = dma.done.wait (%p970_p0), %s665_s13, 1024  }
 0x1ac   : > { %1163 = vsyncadd (%p970_p0), %s665_s13, 4294966272  ;;  %p19_p5 = scmp.ge.s32.totalorder %s1278_s14, 4   ;;  %s1411_s18 = smov %s1170_s19 }
 0x1ad   : > { %s1412_s19 = smov %s1174_s20  ;;  %s1413_s20 = smov %s1294_s23 }
 0x1ae   : > { %s1414_s21 = smov %s1278_s14  ;;  %21 = sbr.rel (!%p19_p5) target bundleno = 6 (0x6), region = 93 }
 0x1b3   :  { %671 = vsyncpa [#allocation3], 1 }
 0x1b4   :  { %673 = vsyncpa [#allocation3 + $0x1], 1 }
 0x1b5   :  { %674 = vsyncpa [#allocation6], 1 }
 0x1b6   :  { %675 = vsyncpa [#allocation4], 1 }
 0x1b7   :  { %677 = vsyncpa [#allocation4 + $0x1], 1 }

</bundles_post_ra>
